<compile_context>
chip_gen: v7x
topology: tpu7x:2x2x1
jax: 0.10.0
libtpu: 0.0.40
codegen_flags: <defaults>
</compile_context>

<pallas_src>
import functools

import numpy as np
import jax
import jax.numpy as jnp
from jax.experimental import pallas as pl
from jax.experimental.pallas import tpu as pltpu


def _round_up(x: int, n: int) -> int:
    return (x + n - 1) // n * n


@functools.lru_cache(maxsize=None)
def _dft_weight_np(fft_len: int) -> np.ndarray:
    """(fft_len, 2*fft_bins) interleaved one-sided DFT basis as float32 numpy."""
    fft_bins = fft_len // 2 + 1
    n = np.arange(fft_len)
    k = np.arange(fft_bins).reshape(-1, 1)
    cos_k = np.cos(2.0 * np.pi * k * n / fft_len)       # (K, N)
    sin_k = -np.sin(2.0 * np.pi * k * n / fft_len)      # (K, N)
    # Interleave rows: row 2k = cos, row 2k+1 = -sin -> (2K, N) -> (N, 2K).
    w = np.stack([cos_k, sin_k], axis=1).reshape(2 * fft_bins, fft_len).T
    return np.ascontiguousarray(w, dtype=np.float32)


def _vmem_budget_and_limit() -> tuple:
    """Generation-aware VMEM working-set budget and scoped-vmem limit."""
    mib = 1024 * 1024
    try:
        vmem = int(getattr(pltpu.get_tpu_info(), "vmem_capacity_bytes", 64 * mib))
    except Exception:                    # no TPU info -> conservative (v7x size)
        vmem = 64 * mib
    limit = min(vmem - 16 * mib, 100 * mib)   # headroom for compiler scratch
    limit = max(limit, 32 * mib)
    budget = int(limit * 0.85)
    return budget, limit


def _choose_tiles(m: int, fft_len: int, out_dim: int,
                  x_bytes: int, w_bytes: int, out_bytes: int,
                  vmem_budget: int) -> tuple:
    """Pick (tm, tn): row tile and output-column tile."""
    # Prefer the whole DFT basis resident in VMEM (single column tile).
    tn = out_dim
    if 2 * fft_len * out_dim * w_bytes > vmem_budget // 2:
        # Large fft_len: tile the output columns so W blocks stay small
        # (keeps tm large on v5e/v6e and avoids VMEM overflow on v7x).
        tn = 512
        while tn > 128 and 2 * fft_len * tn * w_bytes > vmem_budget // 2:
            tn //= 2
    # TODO(synk): for extreme fft_len (>= ~32K) a K grid axis with an f32 acc
    # scratch + pl.when init/finalize would also be needed; out of scope here.
    # Bigger row tiles amortize the ~0.35us/grid-step overhead; the measured
    # HBM-roofline knee is around 512 rows.
    target = 2048 if fft_len <= 128 else (1024 if fft_len <= 1024 else 512)
    tm = min(target, _round_up(m, 8))
    tm = max(8, (tm // 8) * 8)
    while tm > 8:
        need = (2 * tm * fft_len * x_bytes        # x tile, double-buffered
                + 2 * tm * tn * out_bytes         # out tile, double-buffered
                + 2 * fft_len * tn * w_bytes)     # W block (counted x2, conservative)
        if need <= vmem_budget:
            break
        tm = max(8, ((tm // 2) // 8) * 8)
    return tm, tn


def _fft_matmul_kernel(x_ref, w_ref, o_ref, *, compute_dtype):
    # x_ref: (tm, fft_len) tile in the input's HBM dtype (typically f32).
    # Cast to the MXU compute dtype here on the VPU (hidden under the DMA
    # pipeline) instead of in a separate XLA pass over HBM.
    x = x_ref[...]
    if x.dtype != compute_dtype:
        x = x.astype(compute_dtype)
    o_ref[...] = jnp.dot(
        x, w_ref[...], preferred_element_type=jnp.float32
    ).astype(o_ref.dtype)


def one_sided_complex_fft(x: jnp.ndarray, fft_len: int, *,
                          compute_dtype=jnp.bfloat16,
                          output_dtype=jnp.float32) -> jnp.ndarray:
    """x: (batch, n_frames, fft_len) -> (batch, n_frames, 2*fft_bins).

    compute_dtype: MXU input dtype. bf16 (default) uses the native MXU path
      with f32 accumulation; deviation from the PyTorch f32 Conv1d grows
      roughly with sqrt(fft_len). Pass jnp.float32 for closest parity.
    output_dtype: dtype of the stored spectrum (f32 default; bf16 halves
      output HBM traffic if the consumer tolerates it).
    """
    assert x.ndim == 3 and x.shape[2] == fft_len, (
        "Input must be (batch_size, n_frames, fft_len).")
    batch, n_frames, _ = x.shape
    fft_bins = fft_len // 2 + 1
    out_dim = 2 * fft_bins
    m = batch * n_frames

    compute_dtype = jnp.dtype(compute_dtype)
    output_dtype = jnp.dtype(output_dtype)
    x_bytes = jnp.dtype(x.dtype).itemsize
    w_bytes = compute_dtype.itemsize
    out_bytes = output_dtype.itemsize

    # No .astype and no padding here: x tiles are DMA'd as-is and cast in-kernel.
    x2d = x.reshape(m, fft_len)
    # DFT basis: cached as numpy, converted per call (constant-folded under jit).
    w = jnp.asarray(_dft_weight_np(fft_len), dtype=compute_dtype)

    vmem_budget, vmem_limit = _vmem_budget_and_limit()
    tm, tn = _choose_tiles(m, fft_len, out_dim, x_bytes, w_bytes, out_bytes,
                           vmem_budget)
    n_row_tiles = pl.cdiv(m, tm)     # partial last block instead of a jnp.pad copy
    n_col_tiles = pl.cdiv(out_dim, tn)
    # Column axis is OUTER so each W block stays resident across the row sweep;
    # in the common single-column-tile case both x and W are read exactly once.
    grid = (n_col_tiles, n_row_tiles)

    cost = pl.CostEstimate(
        flops=2 * m * fft_len * out_dim,
        transcendentals=0,
        bytes_accessed=(n_col_tiles * m * fft_len * x_bytes
                        + fft_len * out_dim * w_bytes
                        + m * out_dim * out_bytes),
    )

    out2d = pl.pallas_call(
        functools.partial(_fft_matmul_kernel, compute_dtype=compute_dtype),
        out_shape=jax.ShapeDtypeStruct((m, out_dim), output_dtype),
        grid_spec=pltpu.PrefetchScalarGridSpec(
            num_scalar_prefetch=0,
            grid=grid,
            in_specs=[
                pl.BlockSpec((tm, fft_len), lambda j, i: (i, 0)),
                # W block index depends only on the outer (column) axis, so it
                # is re-DMA'd only when the column tile changes.
                # TODO(synk): pipeline_mode=pl.Buffered(1) would reclaim the
                # redundant second W buffer; kept on the default lowering path
                # and the VMEM accounting above conservatively counts it x2.
                pl.BlockSpec((fft_len, tn), lambda j, i: (0, j)),
            ],
            out_specs=pl.BlockSpec((tm, tn), lambda j, i: (i, j)),
        ),
        compiler_params=pltpu.CompilerParams(
            # Both axes are fully parallel (no reduction axis); lets megacore /
            # dual-TC parts shard the grid across cores.
            dimension_semantics=("parallel", "parallel"),
            vmem_limit_bytes=vmem_limit,
        ),
        cost_estimate=cost,
    )(x2d, w)

    # No row/column stripping needed: the kernel writes exactly (m, out_dim).
    return out2d.reshape(batch, n_frames, out_dim)


if __name__ == "__main__":
    batch, n_frames, fft_len = 2, 8, 16
    fft_bins = fft_len // 2 + 1
    out_dim = 2 * fft_bins

    key = jax.random.PRNGKey(0)
    x = jax.random.normal(key, (batch, n_frames, fft_len), dtype=jnp.float32)

    # Exact f32 reference (same math as the PyTorch module's fixed Conv1d weights).
    w_exact = _dft_weight_np(fft_len)
    x_np = np.asarray(x, dtype=np.float32)
    ref_f32 = (x_np.reshape(-1, fft_len) @ w_exact).reshape(batch, n_frames, -1)

    # Default path: bf16 MXU inputs (cast in-kernel), f32 accumulation/output.
    out = jax.block_until_ready(one_sided_complex_fft(x, fft_len))
    assert out.shape == (batch, n_frames, out_dim), out.shape

    # Reference using the same bf16 quantization of x and W (f32 accumulation).
    x_q = np.asarray(x.astype(jnp.bfloat16).astype(jnp.float32))
    w_q = np.asarray(jnp.asarray(w_exact).astype(jnp.bfloat16).astype(jnp.float32))
    ref_q = (x_q.reshape(-1, fft_len) @ w_q).reshape(batch, n_frames, -1)

    out_np = np.asarray(out, dtype=np.float32)
    assert np.allclose(out_np, ref_q, atol=5e-3, rtol=5e-3), (
        "bf16 path max|err| vs quantized ref:",
        float(np.max(np.abs(out_np - ref_q))))
    assert np.allclose(out_np, ref_f32, atol=1e-1, rtol=5e-2), (
        "bf16 path max|err| vs f32 ref:",
        float(np.max(np.abs(out_np - ref_f32))))

    # Parity path: f32 compute (no in-kernel cast).
    out32 = jax.block_until_ready(
        one_sided_complex_fft(x, fft_len, compute_dtype=jnp.float32))
    out32_np = np.asarray(out32, dtype=np.float32)
    assert out32.shape == (batch, n_frames, out_dim), out32.shape
    assert np.allclose(out32_np, ref_f32, atol=1e-1, rtol=5e-2), (
        "f32 path max|err| vs f32 ref:",
        float(np.max(np.abs(out32_np - ref_f32))))

    print("KERNEL_OK")
</pallas_src>

<mosaic_0001>
module attributes {stable_mosaic.version = 11 : i64} {
  func.func @_fft_matmul_kernel(%arg0: i32, %arg1: i32, %arg2: memref<16x16xf32, #tpu.memory_space<vmem>>, %arg3: memref<16x18xbf16, #tpu.memory_space<vmem>>, %arg4: memref<16x18xf32, #tpu.memory_space<vmem>>) attributes {dimension_semantics = [#tpu.dimension_semantics<parallel>, #tpu.dimension_semantics<parallel>], iteration_bounds = array<i64: 1, 1>, scalar_prefetch = 0 : i64, scratch_operands = 0 : i64, tpu.core_type = #tpu.core_type<tc>, window_params = [{transform_indices = @transform_0, window_bounds = array<i64: 16, 16>}, {transform_indices = @transform_1, window_bounds = array<i64: 16, 18>}, {transform_indices = @transform_2, window_bounds = array<i64: 16, 18>}]} {
    %c0 = arith.constant 0 : index
    %c0_0 = arith.constant 0 : index
    %0 = vector.load %arg2[%c0, %c0_0] : memref<16x16xf32, #tpu.memory_space<vmem>>, vector<16x16xf32>
    %1 = arith.truncf %0 : vector<16x16xf32> to vector<16x16xbf16>
    %c0_1 = arith.constant 0 : index
    %c0_2 = arith.constant 0 : index
    %2 = vector.load %arg3[%c0_1, %c0_2] : memref<16x18xbf16, #tpu.memory_space<vmem>>, vector<16x18xbf16>
    %cst = arith.constant dense<0.000000e+00> : vector<16x18xf32>
    %3 = tpu.matmul %1, %2, %cst {dimension_numbers = #tpu.dot_dimension_numbers<[1], [0], [0], [1], [0, 0, 1, 1], [], []>} : vector<16x16xbf16>, vector<16x18xbf16>, vector<16x18xf32> -> vector<16x18xf32>
    %c0_3 = arith.constant 0 : index
    %c0_4 = arith.constant 0 : index
    %4 = vector.load %arg4[%c0_3, %c0_4] : memref<16x18xf32, #tpu.memory_space<vmem>>, vector<16x18xf32>
    tpu.vector_store %arg4[%c0_3, %c0_4], %3 {strides = array<i32>} : memref<16x18xf32, #tpu.memory_space<vmem>>, vector<16x18xf32>,
    return
  }
  func.func @transform_0(%arg0: i32, %arg1: i32) -> (i32, i32) {
    %c0_i32 = arith.constant 0 : i32
    %c0_i32_0 = arith.constant 0 : i32
    return %arg1, %c0_i32 : i32, i32
  }
  func.func @transform_1(%arg0: i32, %arg1: i32) -> (i32, i32) {
    %c0_i32 = arith.constant 0 : i32
    %c0_i32_0 = arith.constant 0 : i32
    return %c0_i32, %arg0 : i32, i32
  }
  func.func @transform_2(%arg0: i32, %arg1: i32) -> (i32, i32) {
    %c0_i32 = arith.constant 0 : i32
    return %arg1, %arg0 : i32, i32
  }
}

</mosaic_0001>

<bundles_post_ra>
// kernel: tpu_custom_call.1
= control target key start
LH: loop header
LB: loop body
LE: loop exit
PB: predicated region body
PF: predicated region fallthrough
CT: control target
= control target key end

     0   :  { %7 = vsyncpa [#allocation3], 0  ;;  %s276_s0 = inlined_call_operand.hbm [shape: f32[16,16], index: 0, kind: input, shape index: {}]   ;;  %s277_s1 = inlined_call_operand.hbm [shape: bf16[16,18], index: 1, kind: input, shape index: {}]   ;;  %s278_s2 = inlined_call_operand.hbm [shape: f32[16,18], index: 2, kind: output, shape index: {}]  }
   0x1   :  { %8 = vsyncpa [#allocation6], 0 }
   0x2   :  { %9 = vsyncpa [#allocation4], 0  ;;  %s210_s9 = smov [#allocation2]   ;;  %s138_s13 = scalar_lea.hbm %s276_s0, 256 }
   0x3   :  { %s15_s10 = sshll.u32 %s210_s9, 4  ;;  %p139_p0 = scmp.ne.s32.totalorder %s276_s0, %s138_s13  ;;  %s16_s10 = int_to_ptr.vmem [resolvable:$true] %s15_s10 }
   0x4   :  { %p142_p1 = scmp.lt.u32.totalorder %s138_s13, %s276_s0 }
   0x6   :  { %p144_p2 = pnand %p142_p1, %p139_p0 }
   0x8   :  { %147 = shalt.err (!%p144_p2)
}
   0x9   :  { %s148_s18 = scalar_lea.vmem %s16_s10, 256  ;;  %p153_p4 = scmp.lt.s32.totalorder %s16_s10, %s16_s10 }
   0xa   :  { %p149_p3 = scmp.ne.s32.totalorder %s16_s10, %s148_s18  ;;  %p154_p5 = scmp.lt.s32.totalorder %s148_s18, %s148_s18 }
   0xc   :  { %p155_p6 = por %p154_p5, %p153_p4 }
   0xe   :  { %p156_p7 = pnand %p155_p6, %p149_p3 }
  0x10   :  { %159 = shalt.err (!%p156_p7)
}
  0x11   :  { %s211_s19 = smov 128   ;;  %s212_s20 = smov 8  }
  0x12   :  { %21 = dma.hbm_to_vmem [thread:$0]  %s276_s0, 256, %s16_s10, [#allocation3], %s211_s19, %s211_s19, %s212_s20  }
  0x13   :  { %s213_s23 = smov [#allocation5]   ;;  %s160_s27 = scalar_lea.hbm %s277_s1, 128 }
  0x14   :  { %s27_s24 = sshll.u32 %s213_s23, 4  ;;  %p161_p8 = scmp.ne.s32.totalorder %s277_s1, %s160_s27  ;;  %s28_s24 = int_to_ptr.vmem [resolvable:$true] %s27_s24 }
  0x15   :  { %p164_p9 = scmp.lt.u32.totalorder %s160_s27, %s277_s1 }
  0x17   :  { %p166_p10 = pnand %p164_p9, %p161_p8 }
  0x19   :  { %169 = shalt.err (!%p166_p10)
}
  0x1a   :  { %s170_s4 = scalar_lea.vmem %s28_s24, 128  ;;  %p175_p12 = scmp.lt.s32.totalorder %s28_s24, %s28_s24 }
  0x1b   :  { %p171_p11 = scmp.ne.s32.totalorder %s28_s24, %s170_s4  ;;  %p176_p13 = scmp.lt.s32.totalorder %s170_s4, %s170_s4 }
  0x1d   :  { %p177_p0 = por %p176_p13, %p175_p12 }
  0x1f   :  { %p178_p1 = pnand %p177_p0, %p171_p11 }
  0x21   :  { %181 = shalt.err (!%p178_p1)
}
  0x22   :  { %s214_s0 = smov 64   ;;  %s215_s5 = smov 4  }
  0x23   :  { %33 = dma.hbm_to_vmem [thread:$0]  %s277_s1, 128, %s28_s24, [#allocation6], %s214_s0, %s214_s0, %s215_s5  }
  0x24   :  { %204 = dma.done.wait [#allocation3], 256  }
  0x25   :  { %205 = vsyncadd [#allocation3], 4294967040 }
  0x26   :  { %206 = dma.done.wait [#allocation6], 128  }
  0x27   :  { %207 = vsyncadd [#allocation6], 4294967168  ;;  %v216_v0 = vmov 0.0   ;;  %vm217_vm0 = vmmov 0   ;;  %v137_v1 = vld [vmem:[#allocation5] sm:$0xff]   ;;  %v41_v2 = vld [vmem:[#allocation2] sm:$0xff] }
  0x28   :  { %122 = vmatprep.subr.bf16.mxu0 %v216_v0  ;;  %124 = vmatprep.mubr.msk.bf16.mxu0 %vm217_vm0, %v216_v0  ;;  %v42_v3 = vld [vmem:[#allocation2 + $0x8] sm:$0xff]  ;;  %vm52_vm1 = vcmask 130048   ;;  %vm97_vm2 = vcmask 146432   ;;  %s218_s8 = smov [#allocation7]  }
  0x29   :  { %123 = vmatpush3.bf16.msra.mxu0 %v137_v1  ;;  %v43_v4 = vpack.c.bf16 %v42_v3, %v41_v2  ;;  %s105_s9 = sshll.u32 %s218_s8, 4  ;;  %s106_s9 = int_to_ptr.vmem [resolvable:$true] %s105_s9 }
  0x2a   :  { %s182_s1 = scalar_lea.vmem %s106_s9, 256  ;;  %p187_p3 = scmp.lt.s32.totalorder %s106_s9, %s106_s9 }
  0x2b   :  { %p183_p2 = scmp.ne.s32.totalorder %s106_s9, %s182_s1  ;;  %p188_p4 = scmp.lt.s32.totalorder %s182_s1, %s182_s1 }
  0x2c   :  { %125 = vmatmul.mubr.msk.bf16.vlgmr.msra.gmra.mrb[0].mxu0 %vm52_vm1, %v43_v4 }
  0x2d   :  { %p189_p5 = por %p188_p4, %p187_p3 }
  0x2f   :  { %p190_p6 = pnand %p189_p5, %p183_p2 }
  0xff   :  { %v90_v5 = vpop.f32.mrb[0].mxu0 }
 0x100   :  { %98 = vst.msk [vmem:[#allocation7] sm:$0xff] %vm97_vm2, %v90_v5  ;;  %v126_v6 = vpop.f32.mrb[1].mxu0 }
 0x101   :  { %v93_v7 = vpop.f32.mrb[2].mxu0 }
 0x102   :  { %99 = vst.msk [vmem:[#allocation7 + $0x8] sm:$0xff] %vm97_vm2, %v93_v7  ;;  %v127_v8 = vpop.f32.mrb[3].mxu0 }
 0x103   :  { %193 = shalt.err (!%p190_p6)
}
 0x104   :  { %s194_s12 = scalar_lea.hbm %s278_s2, 256 }
 0x105   :  { %p195_p7 = scmp.ne.s32.totalorder %s278_s2, %s194_s12  ;;  %p198_p8 = scmp.lt.u32.totalorder %s194_s12, %s278_s2 }
 0x107   :  { %p200_p9 = pnand %p198_p8, %p195_p7 }
 0x109   :  { %203 = shalt.err (!%p200_p9)
}
 0x10a   :  { %111 = dma.vmem_to_hbm [thread:$0]  %s106_s9, 256, %s278_s2, [#allocation4], %s211_s19, %s211_s19, %s212_s20  }
 0x10b   :  { %208 = dma.done.wait [#allocation4], 256  }
 0x10c   :  { %209 = vsyncadd [#allocation4], 4294967040 }
 0x10d   :  { %115 = vsyncpa [#allocation3], 1 }
 0x10e   :  { %116 = vsyncpa [#allocation6], 1 }
 0x10f   :  { %117 = vsyncpa [#allocation4], 1 }

</bundles_post_ra>
